<compile_context>
chip_gen: v7x
topology: tpu7x:2x2x1
jax: 0.10.0
libtpu: 0.0.40
codegen_flags: <defaults>
</compile_context>

<pallas_src>
import functools

import jax
import jax.numpy as jnp
from jax.experimental import pallas as pl
from jax.experimental.pallas import tpu as pltpu

LANE = 128
SUBLANE = 8


def _round_up(x, m):
    return ((x + m - 1) // m) * m


def _pick_pack(d_in, d_out):
    """Logical rows packed per 128-lane row (pure row-major reshape in HBM)."""
    for p in (4, 2):
        if (p * d_in) % LANE == 0 and (p * d_out) % LANE == 0:
            return p
    return 1  # fallback: unpacked, block last-dim == full array dim (still legal)


def _block_diag(w, p):
    """p copies of w on the block diagonal == kron(I_p, w)."""
    if p == 1:
        return w
    return jnp.kron(jnp.eye(p, dtype=w.dtype), w)


def _decoder_kernel(x_ref,
                    w1_ref, b1_ref,        # decoder Linear 1 (block-diag)
                    wc_ref, bc_ref,        # [decoder L2 | folded postnet L1]
                    w4_ref, b4_ref,        # postnet Linear 2 (block-diag)
                    o_ref,
                    *, pdec, approx_sigmoid):
    """Fused decoder + postnet + residual + sigmoid on one packed row tile."""
    x = x_ref[...]                                           # (tile, PIN)

    # ---- decoder trunk: Linear -> ReLU (f32 accumulation) ----
    h = jnp.dot(x, w1_ref[...], preferred_element_type=jnp.float32) + b1_ref[...]
    h = jnp.maximum(h, 0.0)                                  # nn.ReLU()

    # ---- combined matmul: [dec | postnet-pre-activation] in one pass ----
    combo = jnp.dot(h.astype(wc_ref.dtype), wc_ref[...],
                    preferred_element_type=jnp.float32) + bc_ref[...]
    dec = combo[:, :pdec]                                    # packed decoder output
    pp = jnp.tanh(combo[:, pdec:])                           # nn.Tanh() on postnet hidden

    # ---- postnet Linear 2 ----
    post = jnp.dot(pp.astype(w4_ref.dtype), w4_ref[...],
                   preferred_element_type=jnp.float32) + b4_ref[...]

    # ---- residual + output nonlinearity (eval mode), all in f32 ----
    z = dec + post
    if approx_sigmoid:
        out = pl.reciprocal(1.0 + jnp.exp(-z), approx=True)  # exp + recip on the EUP
    else:
        out = jax.nn.sigmoid(z)
    o_ref[...] = out.astype(o_ref.dtype)


def decoder_forward(last, params, *, tile_rows=4096,
                    compute_dtype=jnp.bfloat16, approx_sigmoid=False,
                    out_dtype=None):
    """last: [B, C, T, D_in]. Returns [B, C*T, D_out] (eval-mode forward)."""
    B, C, T, D_in = last.shape
    w1, b1, w2, b2, w3, b3, w4, b4 = params
    H = w1.shape[1]
    D_out = w2.shape[1]
    out_dtype = last.dtype if out_dtype is None else out_dtype

    rows = B * C * T
    pack = _pick_pack(D_in, D_out)

    # Pad rows only to the pack*8 alignment (<= 31 extra rows); no pad op is
    # emitted when already aligned (the common case).  Never pad to a full tile.
    rows_p = _round_up(rows, pack * SUBLANE)

    PIN = pack * D_in        # packed input width   (128 here)
    PH = pack * H            # packed hidden width  (256 here)
    PDEC = pack * D_out      # packed output width  (128 here)

    # ---- activations: row-major reshape (layout-free) + optional dtype cast ----
    x2d = last.reshape(rows, D_in)
    if x2d.dtype != compute_dtype:
        # Under jit this fuses with the reshape; ideally the producer of `last`
        # already emits compute_dtype so no extra HBM pass exists at all.
        x2d = x2d.astype(compute_dtype)
    if rows_p != rows:
        x2d = jnp.pad(x2d, ((0, rows_p - rows), (0, 0)))
    xp = x2d.reshape(rows_p // pack, PIN)

    # ---- weights (tiny): fold postnet-L1 into decoder-L2, then block-diag ----
    #   dec   = h @ W2 + b2
    #   p_pre = dec @ W3 + b3 = h @ (W2 @ W3) + (b2 @ W3 + b3)
    w23 = w2 @ w3
    b23 = b2 @ w3 + b3
    w1p = _block_diag(w1, pack).astype(compute_dtype)                     # (PIN, PH)
    b1p = jnp.tile(b1, (1, pack))                                         # (1, PH)  f32
    wcp = jnp.concatenate([_block_diag(w2, pack),
                           _block_diag(w23, pack)], axis=1).astype(compute_dtype)
    bcp = jnp.concatenate([jnp.tile(b2, (1, pack)),
                           jnp.tile(b23, (1, pack))], axis=1)             # (1, PDEC+PH)
    w4p = _block_diag(w4, pack).astype(compute_dtype)                     # (PH, PDEC)
    b4p = jnp.tile(b4, (1, pack))                                         # (1, PDEC)

    # ---- row tiling: big tiles, ragged cdiv grid, >=2 steps for v7x dual-TC ----
    R = rows_p // pack
    max_tile_p = max(SUBLANE, tile_rows // pack)
    n_steps = max(1, pl.cdiv(R, max_tile_p))
    if R > SUBLANE:
        n_steps = max(n_steps, 2)
    tile_p = _round_up(pl.cdiv(R, n_steps), SUBLANE)
    grid = (pl.cdiv(R, tile_p),)

    def row_map(i):
        return (i, 0)

    def const_map(i):
        return (0, 0)

    # Advisory cost estimate (actual performed matmul dims, incl. block-diag).
    flops = 2 * R * (PIN * PH + PH * (PDEC + PH) + PH * PDEC)
    transcendentals = rows_p * (H + D_out)                    # tanh + sigmoid-exp
    itemsize = jnp.dtype(compute_dtype).itemsize
    weight_bytes = ((w1p.size + wcp.size + w4p.size) * itemsize
                    + (b1p.size + bcp.size + b4p.size) * 4)
    bytes_accessed = (rows_p * D_in * itemsize
                      + rows_p * D_out * jnp.dtype(out_dtype).itemsize
                      + weight_bytes)

    kernel = functools.partial(_decoder_kernel, pdec=PDEC,
                               approx_sigmoid=approx_sigmoid)

    out = pl.pallas_call(
        kernel,
        out_shape=jax.ShapeDtypeStruct((R, PDEC), out_dtype),
        grid_spec=pltpu.PrefetchScalarGridSpec(
            num_scalar_prefetch=0,
            grid=grid,
            in_specs=[
                pl.BlockSpec((tile_p, PIN), row_map),          # packed x tile
                pl.BlockSpec((PIN, PH), const_map),            # W1 block-diag
                pl.BlockSpec((1, PH), const_map),              # b1
                pl.BlockSpec((PH, PDEC + PH), const_map),      # [W2 | W2@W3] block-diag
                pl.BlockSpec((1, PDEC + PH), const_map),       # [b2 | b2@W3+b3]
                pl.BlockSpec((PH, PDEC), const_map),           # W4 block-diag
                pl.BlockSpec((1, PDEC), const_map),            # b4
            ],
            out_specs=pl.BlockSpec((tile_p, PDEC), row_map),
        ),
        compiler_params=pltpu.CompilerParams(
            dimension_semantics=("parallel",),
            vmem_limit_bytes=32 * 1024 * 1024),
        cost_estimate=pl.CostEstimate(
            flops=int(flops),
            transcendentals=int(transcendentals),
            bytes_accessed=int(bytes_accessed)),
    )(xp, w1p, b1p, wcp, bcp, w4p, b4p)

    # Unpack: pure row-major reshape back to logical rows; slice only if padded.
    out = out.reshape(rows_p, D_out)
    if rows_p != rows:
        out = out[:rows]
    return out.reshape(B, C * T, D_out)


def _init_params(key, d_in, hidden, d_out):
    """Deterministic parameter init (weights stored as [in, out])."""
    ks = jax.random.split(key, 8)

    def lin(kw, kb, fan_in, fan_out):
        bound = 1.0 / jnp.sqrt(fan_in)
        w = jax.random.uniform(kw, (fan_in, fan_out), jnp.float32, -bound, bound)
        b = jax.random.uniform(kb, (1, fan_out), jnp.float32, -bound, bound)
        return w, b

    w1, b1 = lin(ks[0], ks[1], d_in, hidden)     # decoder Linear(32, 64)
    w2, b2 = lin(ks[2], ks[3], hidden, d_out)    # decoder Linear(64, 32)
    w3, b3 = lin(ks[4], ks[5], d_out, hidden)    # postnet Linear(32, 64)
    w4, b4 = lin(ks[6], ks[7], hidden, d_out)    # postnet Linear(64, 32)
    return (w1, b1, w2, b2, w3, b3, w4, b4)


def _reference_forward(last, params):
    """Pure-JAX reference mirroring the PyTorch forward (eval mode, un-folded)."""
    w1, b1, w2, b2, w3, b3, w4, b4 = params
    B, C, T, D = last.shape
    x = last.reshape(B, C * T, D)                            # flatten(1, 2)
    h = jnp.maximum(x @ w1 + b1, 0.0)
    dec = h @ w2 + b2
    p = jnp.tanh(dec @ w3 + b3)
    post = p @ w4 + b4
    return jax.nn.sigmoid(dec + post)


if __name__ == "__main__":
    B, C, T, D_in = 2, 4, 8, 32
    HIDDEN, D_OUT = 64, 32

    key = jax.random.PRNGKey(0)
    k_x, k_p = jax.random.split(key)
    last = jax.random.normal(k_x, (B, C, T, D_in), jnp.float32)
    params = _init_params(k_p, D_in, HIDDEN, D_OUT)

    ref = _reference_forward(last, params)

    # Exact f32 path (tight tolerance; exercises the folded / packed kernel).
    f32_fwd = jax.jit(functools.partial(decoder_forward,
                                        compute_dtype=jnp.float32))
    out_f32 = jax.block_until_ready(f32_fwd(last, params))
    assert out_f32.shape == (B, C * T, D_OUT), out_f32.shape
    assert jnp.allclose(out_f32, ref, atol=2e-5, rtol=2e-5), "f32 mismatch vs reference"

    # Default path: bf16 MXU inputs (HBM-byte optimization on v6e/v7x, v5e-safe
    # f32 accumulation/elementwise) + EUP-friendly approximate sigmoid.
    bf16_fwd = jax.jit(functools.partial(decoder_forward, approx_sigmoid=True))
    out_bf16 = jax.block_until_ready(bf16_fwd(last, params))
    assert out_bf16.shape == (B, C * T, D_OUT), out_bf16.shape
    assert jnp.allclose(out_bf16, ref, atol=2e-2, rtol=2e-2), "bf16 mismatch vs reference"

    # TODO(synk): skip_idx/skip_layer path and training-mode dual output not
    # exercised (skip_idx=None, eval mode) in this synthetic instantiation.
    print("KERNEL_OK")
</pallas_src>

<mosaic_0001>
module attributes {stable_mosaic.version = 11 : i64} {
  func.func @_decoder_kernel(%arg0: i32, %arg1: memref<8x128xf32, #tpu.memory_space<vmem>>, %arg2: memref<128x256xf32, #tpu.memory_space<vmem>>, %arg3: memref<1x256xf32, #tpu.memory_space<vmem>>, %arg4: memref<256x384xf32, #tpu.memory_space<vmem>>, %arg5: memref<1x384xf32, #tpu.memory_space<vmem>>, %arg6: memref<256x128xf32, #tpu.memory_space<vmem>>, %arg7: memref<1x128xf32, #tpu.memory_space<vmem>>, %arg8: memref<8x128xf32, #tpu.memory_space<vmem>>) attributes {dimension_semantics = [#tpu.dimension_semantics<parallel>], iteration_bounds = array<i64: 2>, scalar_prefetch = 0 : i64, scratch_operands = 0 : i64, tpu.core_type = #tpu.core_type<tc>, window_params = [{transform_indices = @transform_0, window_bounds = array<i64: 8, 128>}, {pipeline_mode = #tpu.pipeline_mode<synchronous>, transform_indices = @transform_1, window_bounds = array<i64: 128, 256>}, {pipeline_mode = #tpu.pipeline_mode<synchronous>, transform_indices = @transform_2, window_bounds = array<i64: 1, 256>}, {pipeline_mode = #tpu.pipeline_mode<synchronous>, transform_indices = @transform_3, window_bounds = array<i64: 256, 384>}, {pipeline_mode = #tpu.pipeline_mode<synchronous>, transform_indices = @transform_4, window_bounds = array<i64: 1, 384>}, {pipeline_mode = #tpu.pipeline_mode<synchronous>, transform_indices = @transform_5, window_bounds = array<i64: 256, 128>}, {pipeline_mode = #tpu.pipeline_mode<synchronous>, transform_indices = @transform_6, window_bounds = array<i64: 1, 128>}, {transform_indices = @transform_7, window_bounds = array<i64: 8, 128>}]} {
    %c0 = arith.constant 0 : index
    %c0_0 = arith.constant 0 : index
    %0 = vector.load %arg1[%c0, %c0_0] : memref<8x128xf32, #tpu.memory_space<vmem>>, vector<8x128xf32>
    %c0_1 = arith.constant 0 : index
    %c0_2 = arith.constant 0 : index
    %1 = vector.load %arg2[%c0_1, %c0_2] : memref<128x256xf32, #tpu.memory_space<vmem>>, vector<128x256xf32>
    %cst = arith.constant dense<0.000000e+00> : vector<8x256xf32>
    %2 = tpu.matmul %0, %1, %cst {dimension_numbers = #tpu.dot_dimension_numbers<[1], [0], [0], [1], [0, 0, 1, 1], [], []>} : vector<8x128xf32>, vector<128x256xf32>, vector<8x256xf32> -> vector<8x256xf32>
    %c0_3 = arith.constant 0 : index
    %c0_4 = arith.constant 0 : index
    %3 = vector.load %arg3[%c0_3, %c0_4] : memref<1x256xf32, #tpu.memory_space<vmem>>, vector<1x256xf32>
    %4 = vector.broadcast %3 : vector<1x256xf32> to vector<8x256xf32>
    %5 = arith.addf %2, %4 : vector<8x256xf32>
    %cst_5 = arith.constant 0.000000e+00 : f32
    %6 = vector.broadcast %cst_5 : f32 to vector<8x256xf32>
    %7 = arith.maximumf %5, %6 : vector<8x256xf32>
    %c0_6 = arith.constant 0 : index
    %c0_7 = arith.constant 0 : index
    %8 = vector.load %arg4[%c0_6, %c0_7] : memref<256x384xf32, #tpu.memory_space<vmem>>, vector<256x384xf32>
    %cst_8 = arith.constant dense<0.000000e+00> : vector<8x384xf32>
    %9 = tpu.matmul %7, %8, %cst_8 {dimension_numbers = #tpu.dot_dimension_numbers<[1], [0], [0], [1], [0, 0, 1, 1], [], []>} : vector<8x256xf32>, vector<256x384xf32>, vector<8x384xf32> -> vector<8x384xf32>
    %c0_9 = arith.constant 0 : index
    %c0_10 = arith.constant 0 : index
    %10 = vector.load %arg5[%c0_9, %c0_10] : memref<1x384xf32, #tpu.memory_space<vmem>>, vector<1x384xf32>
    %11 = vector.broadcast %10 : vector<1x384xf32> to vector<8x384xf32>
    %12 = arith.addf %9, %11 : vector<8x384xf32>
    %13 = vector.extract_strided_slice %12 {offsets = [0, 0], sizes = [8, 128], strides = [1, 1]} : vector<8x384xf32> to vector<8x128xf32>
    %14 = vector.extract_strided_slice %12 {offsets = [0, 128], sizes = [8, 256], strides = [1, 1]} : vector<8x384xf32> to vector<8x256xf32>
    %15 = math.tanh %14 : vector<8x256xf32>
    %c0_11 = arith.constant 0 : index
    %c0_12 = arith.constant 0 : index
    %16 = vector.load %arg6[%c0_11, %c0_12] : memref<256x128xf32, #tpu.memory_space<vmem>>, vector<256x128xf32>
    %cst_13 = arith.constant dense<0.000000e+00> : vector<8x128xf32>
    %17 = tpu.matmul %15, %16, %cst_13 {dimension_numbers = #tpu.dot_dimension_numbers<[1], [0], [0], [1], [0, 0, 1, 1], [], []>} : vector<8x256xf32>, vector<256x128xf32>, vector<8x128xf32> -> vector<8x128xf32>
    %c0_14 = arith.constant 0 : index
    %c0_15 = arith.constant 0 : index
    %18 = vector.load %arg7[%c0_14, %c0_15] : memref<1x128xf32, #tpu.memory_space<vmem>>, vector<1x128xf32>
    %19 = vector.broadcast %18 : vector<1x128xf32> to vector<8x128xf32>
    %20 = arith.addf %17, %19 : vector<8x128xf32>
    %21 = arith.addf %13, %20 : vector<8x128xf32>
    %22 = arith.negf %21 : vector<8x128xf32>
    %23 = math.exp %22 : vector<8x128xf32>
    %cst_16 = arith.constant 1.000000e+00 : f32
    %24 = vector.broadcast %cst_16 : f32 to vector<8x128xf32>
    %25 = arith.addf %24, %23 : vector<8x128xf32>
    %26 = arith.divf %24, %25 : vector<8x128xf32>
    %c0_17 = arith.constant 0 : index
    %c0_18 = arith.constant 0 : index
    %27 = vector.load %arg8[%c0_17, %c0_18] : memref<8x128xf32, #tpu.memory_space<vmem>>, vector<8x128xf32>
    tpu.vector_store %arg8[%c0_17, %c0_18], %26 {strides = array<i32>} : memref<8x128xf32, #tpu.memory_space<vmem>>, vector<8x128xf32>,
    return
  }
  func.func @transform_0(%arg0: i32) -> (i32, i32) {
    %c0_i32 = arith.constant 0 : i32
    %c0_i32_0 = arith.constant 0 : i32
    return %arg0, %c0_i32 : i32, i32
  }
  func.func @transform_1(%arg0: i32) -> (i32, i32) {
    %c0_i32 = arith.constant 0 : i32
    %c0_i32_0 = arith.constant 0 : i32
    %c0_i32_1 = arith.constant 0 : i32
    return %c0_i32, %c0_i32_0 : i32, i32
  }
  func.func @transform_2(%arg0: i32) -> (i32, i32) {
    %c0_i32 = arith.constant 0 : i32
    %c0_i32_0 = arith.constant 0 : i32
    %c0_i32_1 = arith.constant 0 : i32
    return %c0_i32, %c0_i32_0 : i32, i32
  }
  func.func @transform_3(%arg0: i32) -> (i32, i32) {
    %c0_i32 = arith.constant 0 : i32
    %c0_i32_0 = arith.constant 0 : i32
    %c0_i32_1 = arith.constant 0 : i32
    return %c0_i32, %c0_i32_0 : i32, i32
  }
  func.func @transform_4(%arg0: i32) -> (i32, i32) {
    %c0_i32 = arith.constant 0 : i32
    %c0_i32_0 = arith.constant 0 : i32
    %c0_i32_1 = arith.constant 0 : i32
    return %c0_i32, %c0_i32_0 : i32, i32
  }
  func.func @transform_5(%arg0: i32) -> (i32, i32) {
    %c0_i32 = arith.constant 0 : i32
    %c0_i32_0 = arith.constant 0 : i32
    %c0_i32_1 = arith.constant 0 : i32
    return %c0_i32, %c0_i32_0 : i32, i32
  }
  func.func @transform_6(%arg0: i32) -> (i32, i32) {
    %c0_i32 = arith.constant 0 : i32
    %c0_i32_0 = arith.constant 0 : i32
    %c0_i32_1 = arith.constant 0 : i32
    return %c0_i32, %c0_i32_0 : i32, i32
  }
  func.func @transform_7(%arg0: i32) -> (i32, i32) {
    %c0_i32 = arith.constant 0 : i32
    %c0_i32_0 = arith.constant 0 : i32
    return %arg0, %c0_i32 : i32, i32
  }
}

</mosaic_0001>

<bundles_post_ra>
// kernel: decoder_forward.1
= control target key start
LH: loop header
LB: loop body
LE: loop exit
PB: predicated region body
PF: predicated region fallthrough
CT: control target
= control target key end

     0   :  { %s1125_s24 = smov 0   ;;  %s1661_s0 = inlined_call_operand.vmem [shape: f32[16,128], index: 0, kind: input, shape index: {}]   ;;  %s1662_s1 = inlined_call_operand.vmem [shape: f32[128,256], index: 1, kind: input, shape index: {}]   ;;  %s1663_s2 = inlined_call_operand.vmem [shape: f32[1,256], index: 2, kind: input, shape index: {}]   ;;  %s1664_s3 = inlined_call_operand.vmem [shape: f32[256,384], index: 3, kind: input, shape index: {}]   ;;  %s1665_s4 = inlined_call_operand.vmem [shape: f32[1,384], index: 4, kind: input, shape index: {}]   ;;  %s1666_s5 = inlined_call_operand.vmem [shape: f32[256,128], index: 5, kind: input, shape index: {}]   ;;  %s1667_s6 = inlined_call_operand.vmem [shape: f32[1,128], index: 6, kind: input, shape index: {}]   ;;  %s1668_s7 = inlined_call_operand.vmem [shape: f32[16,128], index: 7, kind: output, shape index: {}]  }
   0x1 LB: > { %s818_s25 = sadd.s32 4294967295, %s1082_s24   ;;  %p822_p0 = scmp.ge.s32.totalorder %s1082_s24, 1  ;;  %s1082_s24 = sphi %s1125_s24, %s17_s24  }
   0x2   : > { %p236_p1 = scmp.lt.s32.totalorder %s1082_s24, 3 }
   0x4   : > { %p237_p2 = pnand %p822_p0, %p236_p1 }
   0x5   : > { %v276_v0 = vld [vmem:[%s1662_s1 + $0x8] sm:$0xff] (!%p237_p2)  ;;  %v278_v1 = vld [vmem:[%s1662_s1 + $0x18] sm:$0xff] (!%p237_p2)  ;;  %v275_v2 = vld [vmem:[%s1662_s1] sm:$0xff] (!%p237_p2)  ;;  %v1084_v7 = vmov (!%p237_p2), 0.0   ;;  %p1243_p3 = scmp.lt.s32.totalorder (!%p237_p2), %s818_s25, 1 }
   0x6   : > { %240 = sbr.rel (%p237_p2) target bundleno = 733 (0x2dd), region = 48  ;;  %v899_v3 = vpack.c.bf16 (!%p237_p2), %v278_v1, %v276_v0  ;;  %v277_v4 = vld [vmem:[%s1662_s1 + $0x10] sm:$0xff] (!%p237_p2)  ;;  %v280_v5 = vld [vmem:[%s1662_s1 + $0x28] sm:$0xff] (!%p237_p2)  ;;  %v282_v6 = vld [vmem:[%s1662_s1 + $0x38] sm:$0xff] (!%p237_p2)  ;;  %383 = vmatprep.mubr.f32.mxu0 (!%p237_p2), %v1084_v7 }
   0x7   : > { %v901_v8 = vpack.c.bf16 (!%p237_p2), %v277_v4, %v275_v2  ;;  %v903_v9 = vpack.c.bf16 (!%p237_p2), %v282_v6, %v280_v5  ;;  %v279_v10 = vld [vmem:[%s1662_s1 + $0x20] sm:$0xff] (!%p237_p2)  ;;  %v281_v11 = vld [vmem:[%s1662_s1 + $0x30] sm:$0xff] (!%p237_p2)  ;;  %v284_v12 = vld [vmem:[%s1662_s1 + $0x48] sm:$0xff] (!%p237_p2) }
   0x8   : > { %900 = vmatprep.subr.bf16.mxu0 (!%p237_p2), %v899_v3  ;;  %v286_v13 = vld [vmem:[%s1662_s1 + $0x58] sm:$0xff] (!%p237_p2)  ;;  %v905_v14 = vpack.c.bf16 (!%p237_p2), %v281_v11, %v279_v10  ;;  %v283_v16 = vld [vmem:[%s1662_s1 + $0x40] sm:$0xff] (!%p237_p2)  ;;  %v285_v17 = vld [vmem:[%s1662_s1 + $0x50] sm:$0xff] (!%p237_p2) }
   0x9   : > { %902 = vmatpush1.bf16.msra.mxu0 (!%p237_p2), %v901_v8  ;;  %v907_v15 = vpack.c.bf16 (!%p237_p2), %v286_v13, %v284_v12  ;;  %v288_v18 = vld [vmem:[%s1662_s1 + $0x68] sm:$0xff] (!%p237_p2)  ;;  %v290_v19 = vld [vmem:[%s1662_s1 + $0x78] sm:$0xff] (!%p237_p2)  ;;  %v909_v20 = vpack.c.bf16 (!%p237_p2), %v285_v17, %v283_v16  ;;  %v287_v22 = vld [vmem:[%s1662_s1 + $0x60] sm:$0xff] (!%p237_p2) }
   0xa   : > { %904 = vmatprep.subr.bf16.mxu0 (!%p237_p2), %v903_v9  ;;  %v911_v21 = vpack.c.bf16 (!%p237_p2), %v290_v19, %v288_v18  ;;  %v289_v23 = vld [vmem:[%s1662_s1 + $0x70] sm:$0xff] (!%p237_p2)  ;;  %v292_v24 = vld [vmem:[%s1662_s1 + $0x88] sm:$0xff] (!%p237_p2)  ;;  %v294_v25 = vld [vmem:[%s1662_s1 + $0x98] sm:$0xff] (!%p237_p2) }
   0xb   : > { %v291_v26 = vld [vmem:[%s1662_s1 + $0x80] sm:$0xff] (!%p237_p2)  ;;  %v293_v27 = vld [vmem:[%s1662_s1 + $0x90] sm:$0xff] (!%p237_p2)  ;;  %v393_v28 = vld [vmem:[%s1664_s3 + $0x8] sm:$0xff] (!%p237_p2)  ;;  %v913_v31 = vpack.c.bf16 (!%p237_p2), %v289_v23, %v287_v22  ;;  %v915_v36 = vpack.c.bf16 (!%p237_p2), %v294_v25, %v292_v24 }
   0xc   : > { %v396_v29 = vld [vmem:[%s1664_s3 + $0x20] sm:$0xff] (!%p237_p2)  ;;  %v395_v33 = vld [vmem:[%s1664_s3 + $0x18] sm:$0xff] (!%p237_p2)  ;;  %v402_v35 = vld [vmem:[%s1664_s3 + $0x50] sm:$0xff] (!%p237_p2)  ;;  %v917_v46 = vpack.c.bf16 (!%p237_p2), %v293_v27, %v291_v26 }
   0xd   : > { %906 = vmatpush1.bf16.msra.mxu0 %v905_v14  ;;  %v392_v30 = vld [vmem:[%s1664_s3] sm:$0xff]  ;;  %v931_v32 = vpack.c.bf16 %v396_v29, %v393_v28  ;;  %v399_v34 = vld [vmem:[%s1664_s3 + $0x38] sm:$0xff]  ;;  %v398_v39 = vld [vmem:[%s1664_s3 + $0x30] sm:$0xff]  ;;  %s1671_s25 = smov (!%p1243_p3, %s818_s25), 1 }
   0xe   : > { %908 = vmatprep.subr.bf16.mxu0 %v907_v15  ;;  %v933_v37 = vpack.c.bf16 %v395_v33, %v392_v30  ;;  %v935_v38 = vpack.c.bf16 %v402_v35, %v399_v34  ;;  %v401_v40 = vld [vmem:[%s1664_s3 + $0x48] sm:$0xff]  ;;  %v298_v43 = vld [vmem:[%s1662_s1 + $0xb8] sm:$0xff]  ;;  %v408_v44 = vld [vmem:[%s1664_s3 + $0x80] sm:$0xff]  ;;  %s823_s26 = sshll.u32 %s1671_s25, 3 }
   0xf   : > { %v405_v41 = vld [vmem:[%s1664_s3 + $0x68] sm:$0xff]  ;;  %932 = vmatprep.subr.bf16.mxu1 %v931_v32  ;;  %v937_v45 = vpack.c.bf16 %v401_v40, %v398_v39  ;;  %v295_v47 = vld [vmem:[%s1662_s1 + $0xa0] sm:$0xff]  ;;  %v407_v50 = vld [vmem:[%s1664_s3 + $0x78] sm:$0xff]  ;;  %s269_s15 = scalar_lea.vmem %s1661_s0, %s823_s26  ;;  %s273_s11 = scalar_lea.vmem %s1668_s7, %s823_s26 }
  0x10   : > { %v296_v42 = vld [vmem:[%s1662_s1 + $0xa8] sm:$0xff]  ;;  %934 = vmatpush1.bf16.msra.mxu1 %v933_v37  ;;  %v939_v48 = vpack.c.bf16 %v408_v44, %v405_v41  ;;  %v404_v49 = vld [vmem:[%s1664_s3 + $0x60] sm:$0xff]  ;;  %v297_v52 = vld [vmem:[%s1662_s1 + $0xb0] sm:$0xff] }
  0x11   : > { %910 = vmatpush1.bf16.msra.mxu0 %v909_v20  ;;  %936 = vmatprep.subr.bf16.mxu1 %v935_v38  ;;  %v919_v51 = vpack.c.bf16 %v298_v43, %v296_v42  ;;  %v411_v53 = vld [vmem:[%s1664_s3 + $0x98] sm:$0xff]  ;;  %v414_v54 = vld [vmem:[%s1664_s3 + $0xb0] sm:$0xff]  ;;  %v300_v55 = vld [vmem:[%s1662_s1 + $0xc8] sm:$0xff]  ;;  %v941_v57 = vpack.c.bf16 %v407_v50, %v404_v49  ;;  %v921_v58 = vpack.c.bf16 %v297_v52, %v295_v47 }
  0x12   : > { %912 = vmatprep.subr.bf16.mxu0 %v911_v21  ;;  %v302_v56 = vld [vmem:[%s1662_s1 + $0xd8] sm:$0xff]  ;;  %v299_v59 = vld [vmem:[%s1662_s1 + $0xc0] sm:$0xff]  ;;  %v943_v60 = vpack.c.bf16 %v414_v54, %v411_v53  ;;  %v410_v61 = vld [vmem:[%s1664_s3 + $0x90] sm:$0xff] }
  0x13   : > { %v413_v62 = vld [vmem:[%s1664_s3 + $0xa8] sm:$0xff]  ;;  %v923_v63 = vpack.c.bf16 %v302_v56, %v300_v55  ;;  %v301_v0 = vld [vmem:[%s1662_s1 + $0xd0] sm:$0xff]  ;;  %v420_v2 = vld [vmem:[%s1664_s3 + $0xe0] sm:$0xff] }
  0x14   : > { %938 = vmatpush1.bf16.msra.mxu1 %v937_v45  ;;  %v417_v1 = vld [vmem:[%s1664_s3 + $0xc8] sm:$0xff]  ;;  %v306_v4 = vld [vmem:[%s1662_s1 + $0xf8] sm:$0xff]  ;;  %v945_v5 = vpack.c.bf16 %v413_v62, %v410_v61  ;;  %v925_v6 = vpack.c.bf16 %v301_v0, %v299_v59  ;;  %v303_v7 = vld [vmem:[%s1662_s1 + $0xe0] sm:$0xff] }
  0x15   : > { %914 = vmatpush1.bf16.msra.mxu0 %v913_v31  ;;  %940 = vmatprep.subr.bf16.mxu1 %v939_v48  ;;  %v304_v3 = vld [vmem:[%s1662_s1 + $0xe8] sm:$0xff]  ;;  %v947_v8 = vpack.c.bf16 %v420_v2, %v417_v1  ;;  %v416_v9 = vld [vmem:[%s1664_s3 + $0xc0] sm:$0xff]  ;;  %v419_v10 = vld [vmem:[%s1664_s3 + $0xd8] sm:$0xff] }
  0x16   : > { %916 = vmatprep.subr.bf16.mxu0 %v915_v36  ;;  %v927_v11 = vpack.c.bf16 %v306_v4, %v304_v3  ;;  %v305_v12 = vld [vmem:[%s1662_s1 + $0xf0] sm:$0xff]  ;;  %v423_v13 = vld [vmem:[%s1664_s3 + $0xf8] sm:$0xff]  ;;  %v445_v16 = vld [vmem:[%s1664_s3 + $0x1a8] sm:$0xff]  ;;  %v949_v17 = vpack.c.bf16 %v419_v10, %v416_v9 }
  0x17   : > { %v426_v14 = vld [vmem:[%s1664_s3 + $0x110] sm:$0xff]  ;;  %v929_v18 = vpack.c.bf16 %v305_v12, %v303_v7  ;;  %v425_v21 = vld [vmem:[%s1664_s3 + $0x108] sm:$0xff]  ;;  %v432_v23 = vld [vmem:[%s1664_s3 + $0x140] sm:$0xff] }
  0x18   : > { %942 = vmatpush1.bf16.msra.mxu1 %v941_v57  ;;  %v442_v15 = vld [vmem:[%s1664_s3 + $0x190] sm:$0xff]  ;;  %v951_v19 = vpack.c.bf16 %v426_v14, %v423_v13  ;;  %v429_v22 = vld [vmem:[%s1664_s3 + $0x128] sm:$0xff]  ;;  %v448_v27 = vld [vmem:[%s1664_s3 + $0x1c0] sm:$0xff] }
  0x19   : > { %918 = vmatpush1.bf16.msra.mxu0 %v917_v46  ;;  %944 = vmatprep.subr.bf16.mxu1 %v943_v60  ;;  %v422_v20 = vld [vmem:[%s1664_s3 + $0xf0] sm:$0xff]  ;;  %v995_v24 = vpack.c.bf16 %v445_v16, %v442_v15  ;;  %v397_v26 = vld [vmem:[%s1664_s3 + $0x28] sm:$0xff]  ;;  %v451_v28 = vld [vmem:[%s1664_s3 + $0x1d8] sm:$0xff]  ;;  %v955_v31 = vpack.c.bf16 %v432_v23, %v429_v22 }
  0x1a   : > { %920 = vmatprep.subr.bf16.mxu0 %v919_v51  ;;  %v394_v25 = vld [vmem:[%s1664_s3 + $0x10] sm:$0xff]  ;;  %v274_v29 = vld [vmem:[%s269_s15] sm:$0xff]  ;;  %v953_v30 = vpack.c.bf16 %v425_v21, %v422_v20  ;;  %v431_v33 = vld [vmem:[%s1664_s3 + $0x138] sm:$0xff]  ;;  %v999_v37 = vpack.c.bf16 %v451_v28, %v448_v27 }
  0x1b   : > { %v428_v32 = vld [vmem:[%s1664_s3 + $0x120] sm:$0xff]  ;;  %v435_v34 = vld [vmem:[%s1664_s3 + $0x158] sm:$0xff]  ;;  %v997_v35 = vpack.c.bf16 %v397_v26, %v394_v25  ;;  %v438_v36 = vld [vmem:[%s1664_s3 + $0x170] sm:$0xff] }
  0x1c   : > { %946 = vmatpush1.bf16.msra.mxu1 %v945_v5  ;;  %v400_v38 = vld [vmem:[%s1664_s3 + $0x40] sm:$0xff]  ;;  %v403_v39 = vld [vmem:[%s1664_s3 + $0x58] sm:$0xff]  ;;  %v454_v40 = vld [vmem:[%s1664_s3 + $0x1f0] sm:$0xff]  ;;  %v957_v42 = vpack.c.bf16 %v431_v33, %v428_v32  ;;  %v959_v43 = vpack.c.bf16 %v438_v36, %v435_v34 }
  0x1d   : > { %922 = vmatpush1.bf16.msra.mxu0 %v921_v58  ;;  %948 = vmatprep.subr.bf16.mxu1 %v947_v8  ;;  %v457_v41 = vld [vmem:[%s1664_s3 + $0x208] sm:$0xff]  ;;  %v434_v44 = vld [vmem:[%s1664_s3 + $0x150] sm:$0xff]  ;;  %v1001_v47 = vpack.c.bf16 %v403_v39, %v400_v38  ;;  %v444_v48 = vld [vmem:[%s1664_s3 + $0x1a0] sm:$0xff] }
  0x1e   : > { %924 = vmatprep.subr.bf16.mxu0 %v923_v63  ;;  %v437_v45 = vld [vmem:[%s1664_s3 + $0x168] sm:$0xff]  ;;  %v1003_v49 = vpack.c.bf16 %v457_v41, %v454_v40  ;;  %v406_v50 = vld [vmem:[%s1664_s3 + $0x70] sm:$0xff]  ;;  %v460_v52 = vld [vmem:[%s1664_s3 + $0x220] sm:$0xff] }
  0x1f   : > { %v441_v46 = vld [vmem:[%s1664_s3 + $0x188] sm:$0xff]  ;;  %v463_v53 = vld [vmem:[%s1664_s3 + $0x238] sm:$0xff]  ;;  %v961_v54 = vpack.c.bf16 %v437_v45, %v434_v44  ;;  %v440_v56 = vld [vmem:[%s1664_s3 + $0x180] sm:$0xff] }
  0x20   : > { %950 = vmatpush1.bf16.msra.mxu1 %v949_v17  ;;  %v409_v51 = vld [vmem:[%s1664_s3 + $0x88] sm:$0xff]  ;;  %v963_v55 = vpack.c.bf16 %v444_v48, %v441_v46  ;;  %v443_v57 = vld [vmem:[%s1664_s3 + $0x198] sm:$0xff]  ;;  %v450_v60 = vld [vmem:[%s1664_s3 + $0x1d0] sm:$0xff]  ;;  %v1007_v61 = vpack.c.bf16 %v463_v53, %v460_v52 }
  0x21   : > { %926 = vmatpush1.bf16.msra.mxu0 %v925_v6  ;;  %952 = vmatprep.subr.bf16.mxu1 %v951_v19  ;;  %v447_v58 = vld [vmem:[%s1664_s3 + $0x1b8] sm:$0xff]  ;;  %v1005_v59 = vpack.c.bf16 %v409_v51, %v406_v50  ;;  %v412_v62 = vld [vmem:[%s1664_s3 + $0xa0] sm:$0xff]  ;;  %v466_v0 = vld [vmem:[%s1664_s3 + $0x250] sm:$0xff]  ;;  %v965_v2 = vpack.c.bf16 %v443_v57, %v440_v56 }
  0x22   : > { %928 = vmatprep.subr.bf16.mxu0 %v927_v11  ;;  %v415_v63 = vld [vmem:[%s1664_s3 + $0xb8] sm:$0xff]  ;;  %v469_v1 = vld [vmem:[%s1664_s3 + $0x268] sm:$0xff]  ;;  %v967_v3 = vpack.c.bf16 %v450_v60, %v447_v58  ;;  %v446_v4 = vld [vmem:[%s1664_s3 + $0x1b0] sm:$0xff] }
  0x23   : > { %v449_v5 = vld [vmem:[%s1664_s3 + $0x1c8] sm:$0xff]  ;;  %v1009_v7 = vpack.c.bf16 %v415_v63, %v412_v62  ;;  %v456_v8 = vld [vmem:[%s1664_s3 + $0x200] sm:$0xff]  ;;  %v1011_v9 = vpack.c.bf16 %v469_v1, %v466_v0  ;;  %v418_v10 = vld [vmem:[%s1664_s3 + $0xd0] sm:$0xff] }
  0x24   : > { %954 = vmatpush1.bf16.msra.mxu1 %v953_v30  ;;  %v453_v6 = vld [vmem:[%s1664_s3 + $0x1e8] sm:$0xff]  ;;  %v472_v12 = vld [vmem:[%s1664_s3 + $0x280] sm:$0xff]  ;;  %v475_v13 = vld [vmem:[%s1664_s3 + $0x298] sm:$0xff]  ;;  %v969_v14 = vpack.c.bf16 %v449_v5, %v446_v4  ;;  %v309_v5 = vlaneseq }
  0x25   : > { %930 = vmatpush1.bf16.msra.mxu0 %v929_v18  ;;  %956 = vmatprep.subr.bf16.mxu1 %v955_v31  ;;  %v421_v11 = vld [vmem:[%s1664_s3 + $0xe8] sm:$0xff]  ;;  %v971_v15 = vpack.c.bf16 %v456_v8, %v453_v6  ;;  %v452_v16 = vld [vmem:[%s1664_s3 + $0x1e0] sm:$0xff]  ;;  %v455_v17 = vld [vmem:[%s1664_s3 + $0x1f8] sm:$0xff]  ;;  %v1015_v21 = vpack.c.bf16 %v475_v13, %v472_v12 }
  0x26   : > { %996 = vmatprep.subr.bf16.mxu0 %v995_v24  ;;  %v459_v18 = vld [vmem:[%s1664_s3 + $0x218] sm:$0xff]  ;;  %v1013_v19 = vpack.c.bf16 %v421_v11, %v418_v10  ;;  %v462_v20 = vld [vmem:[%s1664_s3 + $0x230] sm:$0xff]  ;;  %v424_v22 = vld [vmem:[%s1664_s3 + $0x100] sm:$0xff]  ;;  %v973_v26 = vpack.c.bf16 %v455_v17, %v452_v16  ;;  %v1541_v6 = vshrl.u32 %v309_v5, 7 }
  0x27   : > { %v427_v23 = vld [vmem:[%s1664_s3 + $0x118] sm:$0xff]  ;;  %v478_v24 = vld [vmem:[%s1664_s3 + $0x2b0] sm:$0xff]  ;;  %v481_v25 = vld [vmem:[%s1664_s3 + $0x2c8] sm:$0xff]  ;;  %v975_v27 = vpack.c.bf16 %v462_v20, %v459_v18 }
  0x28   : > { %384 = vmatmul.mubr.f32.vlgmr.msra.gmra.mrb[0].mxu0 %v274_v29  ;;  %958 = vmatpush1.bf16.msra.mxu1 %v957_v42  ;;  %v458_v28 = vld [vmem:[%s1664_s3 + $0x210] sm:$0xff]  ;;  %v461_v29 = vld [vmem:[%s1664_s3 + $0x228] sm:$0xff]  ;;  %v1017_v30 = vpack.c.bf16 %v427_v23, %v424_v22  ;;  %v468_v32 = vld [vmem:[%s1664_s3 + $0x260] sm:$0xff]  ;;  %v1019_v33 = vpack.c.bf16 %v481_v25, %v478_v24 }
  0x29   : > { %998 = vmatpush3.bf16.msra.mxu0 %v997_v35  ;;  %960 = vmatprep.subr.bf16.mxu1 %v959_v43  ;;  %v465_v31 = vld [vmem:[%s1664_s3 + $0x248] sm:$0xff]  ;;  %v977_v34 = vpack.c.bf16 %v461_v29, %v458_v28  ;;  %v464_v36 = vld [vmem:[%s1664_s3 + $0x240] sm:$0xff]  ;;  %v471_v38 = vld [vmem:[%s1664_s3 + $0x278] sm:$0xff] }
  0x2a   : > { %1000 = vmatprep.subr.bf16.mxu0 %v999_v37  ;;  %v979_v35 = vpack.c.bf16 %v468_v32, %v465_v31  ;;  %v467_v37 = vld [vmem:[%s1664_s3 + $0x258] sm:$0xff]  ;;  %v474_v39 = vld [vmem:[%s1664_s3 + $0x290] sm:$0xff]  ;;  %v473_v43 = vld [vmem:[%s1664_s3 + $0x288] sm:$0xff] }
  0x2b   : > { %v981_v40 = vpack.c.bf16 %v467_v37, %v464_v36  ;;  %v983_v41 = vpack.c.bf16 %v474_v39, %v471_v38  ;;  %v470_v42 = vld [vmem:[%s1664_s3 + $0x270] sm:$0xff]  ;;  %v477_v44 = vld [vmem:[%s1664_s3 + $0x2a8] sm:$0xff]  ;;  %v480_v45 = vld [vmem:[%s1664_s3 + $0x2c0] sm:$0xff] }
  0x2c   : > { %962 = vmatpush1.bf16.msra.mxu1 %v961_v54  ;;  %v985_v46 = vpack.c.bf16 %v473_v43, %v470_v42  ;;  %v476_v48 = vld [vmem:[%s1664_s3 + $0x2a0] sm:$0xff]  ;;  %v430_v50 = vld [vmem:[%s1664_s3 + $0x130] sm:$0xff]  ;;  %v433_v52 = vld [vmem:[%s1664_s3 + $0x148] sm:$0xff] }
  0x2d   : > { %1002 = vmatpush3.bf16.msra.mxu0 %v1001_v47  ;;  %964 = vmatprep.subr.bf16.mxu1 %v963_v55  ;;  %v987_v47 = vpack.c.bf16 %v480_v45, %v477_v44  ;;  %v1021_v53 = vpack.c.bf16 %v433_v52, %v430_v50  ;;  %v483_v54 = vld [vmem:[%s1664_s3 + $0x2d8] sm:$0xff]  ;;  %v486_v55 = vld [vmem:[%s1664_s3 + $0x2f0] sm:$0xff]  ;;  %v484_v56 = vld [vmem:[%s1664_s3 + $0x2e0] sm:$0xff] }
  0x2e   : > { %1004 = vmatprep.subr.bf16.mxu0 %v1003_v49  ;;  %v479_v49 = vld [vmem:[%s1664_s3 + $0x2b8] sm:$0xff]  ;;  %v991_v57 = vpack.c.bf16 %v486_v55, %v483_v54  ;;  %v485_v60 = vld [vmem:[%s1664_s3 + $0x2e8] sm:$0xff]  ;;  %v436_v63 = vld [vmem:[%s1664_s3 + $0x160] sm:$0xff] }
  0x2f   : > { %v989_v51 = vpack.c.bf16 %v479_v49, %v476_v48  ;;  %v487_v58 = vld [vmem:[%s1664_s3 + $0x2f8] sm:$0xff]  ;;  %v307_v8 = vld [vmem:[%s1663_s2] sm:$0x3]  ;;  %v649_v16 = vld [vmem:[%s1666_s5 + $0x8] sm:$0xff] }
  0x30   : > { %966 = vmatpush1.bf16.msra.mxu1 %v965_v2  ;;  %v439_v0 = vld [vmem:[%s1664_s3 + $0x178] sm:$0xff]  ;;  %v664_v2 = vld [vmem:[%s1666_s5 + $0x80] sm:$0xff]  ;;  %v666_v18 = vld [vmem:[%s1666_s5 + $0x90] sm:$0xff] }
  0x31   : > { %1006 = vmatpush3.bf16.msra.mxu0 %v1005_v59  ;;  %968 = vmatprep.subr.bf16.mxu1 %v967_v3  ;;  %v482_v59 = vld [vmem:[%s1664_s3 + $0x2d0] sm:$0xff]  ;;  %v1025_v1 = vpack.c.bf16 %v439_v0, %v436_v63  ;;  %v665_v3 = vld [vmem:[%s1666_s5 + $0x88] sm:$0xff]  ;;  %v651_v25 = vld [vmem:[%s1666_s5 + $0x18] sm:$0xff]  ;;  %v500_v0 = vsub.s32 2, %v1541_v6 }
  0x32   : > { %1008 = vmatprep.subr.bf16.mxu0 %v1007_v61  ;;  %v1023_v61 = vpack.c.bf16 %v487_v58, %v484_v56  ;;  %v993_v62 = vpack.c.bf16 %v485_v60, %v482_v59  ;;  %v1027_v4 = vpack.c.bf16 %v665_v3, %v664_v2  ;;  %v650_v24 = vld [vmem:[%s1666_s5 + $0x10] sm:$0xff]  ;;  %v653_v31 = vld [vmem:[%s1666_s5 + $0x28] sm:$0xff]  ;;  %v655_v37 = vld [vmem:[%s1666_s5 + $0x38] sm:$0xff] }
  0x33   : > { %v1033_v28 = vpack.c.bf16 %v651_v25, %v650_v24  ;;  %v670_v32 = vld [vmem:[%s1666_s5 + $0xb0] sm:$0xff]  ;;  %v672_v39 = vld [vmem:[%s1666_s5 + $0xc0] sm:$0xff]  ;;  %v657_v43 = vld [vmem:[%s1666_s5 + $0x48] sm:$0xff] }
  0x34   : > { %970 = vmatpush1.bf16.msra.mxu1 %v969_v14  ;;  %v654_v36 = vld [vmem:[%s1666_s5 + $0x30] sm:$0xff]  ;;  %v656_v42 = vld [vmem:[%s1666_s5 + $0x40] sm:$0xff]  ;;  %v659_v49 = vld [vmem:[%s1666_s5 + $0x58] sm:$0xff] }
  0x35   : > { %1010 = vmatpush3.bf16.msra.mxu0 %v1009_v7  ;;  %972 = vmatprep.subr.bf16.mxu1 %v971_v15  ;;  %v311_v7 = vsub.s32 0, %v1541_v6  ;;  %v648_v15 = vld [vmem:[%s1666_s5] sm:$0xff]  ;;  %v1041_v38 = vpack.c.bf16 %v655_v37, %v654_v36  ;;  %v1045_v44 = vpack.c.bf16 %v657_v43, %v656_v42  ;;  %v674_v45 = vld [vmem:[%s1666_s5 + $0xd0] sm:$0xff]  ;;  %v677_v52 = vld [vmem:[%s1666_s5 + $0xe8] sm:$0xff] }
  0x36   : > { %1012 = vmatprep.subr.bf16.mxu0 %v1011_v9  ;;  %v315_v9 = vsub.s32 1, %v1541_v6  ;;  %v658_v48 = vld [vmem:[%s1666_s5 + $0x50] sm:$0xff]  ;;  %v661_v55 = vld [vmem:[%s1666_s5 + $0x68] sm:$0xff]  ;;  %v488_v63 = vld [vmem:[%s1665_s4] sm:$0x7] }
  0x37   : > { %v312_v10 = vrot.slane %v307_v8, %v311_v7  ;;  %v1049_v50 = vpack.c.bf16 %v659_v49, %v658_v48  ;;  %v678_v56 = vld [vmem:[%s1666_s5 + $0xf0] sm:$0xff] }
  0x38   : > { %974 = vmatpush1.bf16.msra.mxu1 %v973_v26  ;;  %v316_v11 = vrot.slane %v307_v8, %v315_v9  ;;  %v668_v26 = vld [vmem:[%s1666_s5 + $0xa0] sm:$0xff]  ;;  %v662_v60 = vld [vmem:[%s1666_s5 + $0x70] sm:$0xff] }
  0x39   : > { %1014 = vmatpush3.bf16.msra.mxu0 %v1013_v19  ;;  %976 = vmatprep.subr.bf16.mxu1 %v975_v27  ;;  %v667_v19 = vld [vmem:[%s1666_s5 + $0x98] sm:$0xff]  ;;  %v669_v27 = vld [vmem:[%s1666_s5 + $0xa8] sm:$0xff] }
  0x3a   : > { %1016 = vmatprep.subr.bf16.mxu0 %v1015_v21  ;;  %v1029_v21 = vpack.c.bf16 %v649_v16, %v648_v15  ;;  %v1031_v23 = vpack.c.bf16 %v667_v19, %v666_v18  ;;  %v1035_v29 = vpack.c.bf16 %v669_v27, %v668_v26  ;;  %v493_v15 = vrot.slane %v488_v63, %v311_v7 }
  0x3c   : > { %978 = vmatpush1.bf16.msra.mxu1 %v977_v34 }
  0x3d   : > { %1018 = vmatpush3.bf16.msra.mxu0 %v1017_v30  ;;  %980 = vmatprep.subr.bf16.mxu1 %v979_v35  ;;  %v652_v30 = vld [vmem:[%s1666_s5 + $0x20] sm:$0xff] }
  0x3e   : > { %1020 = vmatprep.subr.bf16.mxu0 %v1019_v33  ;;  %v671_v33 = vld [vmem:[%s1666_s5 + $0xb8] sm:$0xff]  ;;  %v1037_v34 = vpack.c.bf16 %v653_v31, %v652_v30 }
  0x3f   : > { %v1039_v35 = vpack.c.bf16 %v671_v33, %v670_v32 }
  0x40   : > { %982 = vmatpush1.bf16.msra.mxu1 %v981_v40  ;;  %v673_v40 = vld [vmem:[%s1666_s5 + $0xc8] sm:$0xff] }
  0x41   : > { %984 = vmatprep.subr.bf16.mxu1 %v983_v41  ;;  %1022 = vmatpush3.bf16.msra.mxu0 %v1021_v53  ;;  %v1043_v41 = vpack.c.bf16 %v673_v40, %v672_v39  ;;  %v660_v53 = vld [vmem:[%s1666_s5 + $0x60] sm:$0xff] }
  0x42   : > { %1024 = vmatprep.subr.bf16.mxu0 %v1023_v61  ;;  %v1053_v58 = vpack.c.bf16 %v661_v55, %v660_v53  ;;  %v663_v61 = vld [vmem:[%s1666_s5 + $0x78] sm:$0xff] }
  0x44   : > { %986 = vmatpush1.bf16.msra.mxu1 %v985_v46  ;;  %v675_v46 = vld [vmem:[%s1666_s5 + $0xd8] sm:$0xff] }
  0x45   : > { %988 = vmatprep.subr.bf16.mxu1 %v987_v47  ;;  %1026 = vmatpush3.bf16.msra.mxu0 %v1025_v1  ;;  %v1047_v47 = vpack.c.bf16 %v675_v46, %v674_v45  ;;  %v497_v1 = vrot.slane %v488_v63, %v315_v9  ;;  %v825_v9 = vld [vmem:[%s1667_s6] ss:$0 sm:$0xff] }
  0x46   : > { %1028 = vmatprep.subr.bf16.mxu0 %v1027_v4  ;;  %v501_v4 = vrot.slane %v488_v63, %v500_v0 }
  0x48   : > { %990 = vmatpush1.bf16.msra.mxu1 %v989_v51  ;;  %v676_v51 = vld [vmem:[%s1666_s5 + $0xe0] sm:$0xff] }
  0x49   : > { %992 = vmatprep.subr.bf16.mxu1 %v991_v57  ;;  %v1051_v54 = vpack.c.bf16 %v677_v52, %v676_v51  ;;  %v679_v57 = vld [vmem:[%s1666_s5 + $0xf8] sm:$0xff] }
  0x4a   : > { %v1055_v59 = vpack.c.bf16 %v679_v57, %v678_v56 }
  0x4c   : > { %994 = vmatpush1.bf16.msra.mxu1 %v993_v62  ;;  %v1057_v62 = vpack.c.bf16 %v663_v61, %v662_v60 }
  0xfb   : > { %v385_v12 = vpop.f32.mrb[0].mxu0 }
  0xfc   : > { %v386_v13 = vadd.f32 %v385_v12, %v312_v10  ;;  %v387_v14 = vpop.f32.mrb[1].mxu0 }
  0xfd   : > { %v388_v17 = vadd.f32 %v387_v14, %v316_v11 }
  0xfe   : > { %v390_v22 = vmax.f32 %v386_v13, 0.0 }
  0xff   : > { %v391_v20 = vmax.f32 %v388_v17, 0.0 }
 0x101   : > { %569 = vmatprep.mubr.f32.mxu1 %v391_v20  ;;  %640 = vmatprep.mubr.f32.mxu0 %v391_v20 }
 0x102   : > { %570 = vmatmul.mubr.f32.vlgmr.msra.gmra.mrb[0].mxu1 %v390_v22  ;;  %641 = vmatmul.mubr.f32.vlgmr.msra.gmra.mrb[2].mxu0 %v390_v22 }
 0x103   : > { %1030 = vmatpush3.bf16.msra.mxu0 %v1029_v21 }
 0x104   : > { %1032 = vmatprep.subr.bf16.mxu0 %v1031_v23 }
 0x107   : > { %1034 = vmatpush3.bf16.msra.mxu0 %v1033_v28 }
 0x108   : > { %1036 = vmatprep.subr.bf16.mxu0 %v1035_v29 }
 0x10b   : > { %1038 = vmatpush3.bf16.msra.mxu0 %v1037_v34 }
 0x10c   : > { %1040 = vmatprep.subr.bf16.mxu0 %v1039_v35 }
 0x10f   : > { %1042 = vmatpush3.bf16.msra.mxu0 %v1041_v38 }
 0x110   : > { %1044 = vmatprep.subr.bf16.mxu0 %v1043_v41 }
 0x113   : > { %1046 = vmatpush3.bf16.msra.mxu0 %v1045_v44 }
 0x114   : > { %1048 = vmatprep.subr.bf16.mxu0 %v1047_v47 }
 0x117   : > { %1050 = vmatpush3.bf16.msra.mxu0 %v1049_v50 }
 0x118   : > { %1052 = vmatprep.subr.bf16.mxu0 %v1051_v54 }
 0x11b   : > { %1054 = vmatpush3.bf16.msra.mxu0 %v1053_v58 }
 0x11c   : > { %1056 = vmatprep.subr.bf16.mxu0 %v1055_v59 }
 0x11f   : > { %1058 = vmatpush3.bf16.msra.mxu0 %v1057_v62 }
 0x1d5   : > { %v571_v2 = vpop.f32.mrb[0].mxu1  ;;  %v861_v3 = vpop.f32.mrb[2].mxu0 }
 0x1d6   : > { %v573_v5 = vpop.f32.mrb[1].mxu1  ;;  %v862_v8 = vpop.f32.mrb[3].mxu0  ;;  %v572_v19 = vadd.f32 %v571_v2, %v493_v15 }
 0x1d7   : > { %v863_v10 = vadd.f32 %v862_v8, %v861_v3  ;;  %v574_v11 = vadd.f32 %v573_v5, %v497_v1 }
 0x1d9   : > { %v643_v12 = vadd.f32 %v863_v10, %v501_v4 }
 0x1db   : > { %1068 = vtanh.f32 %v643_v12 }
 0x1dc   : > { %1070 = vtanh.f32 %v574_v11 }
 0x1e5   : > { %v1069_v13 = vpop.eup %1068 }
 0x1e6   : > { %v1071_v14 = vpop.eup %1070  ;;  %751 = vmatprep.mubr.f32.mxu0 %v1069_v13 }
 0x1e7   : > { %752 = vmatmul.mubr.f32.vlgmr.msra.gmra.mrb[4].mxu0 %v1071_v14 }
 0x2ba   : > { %v896_v16 = vpop.f32.mrb[4].mxu0 }
 0x2bb   : > { %v897_v17 = vpop.f32.mrb[5].mxu0 }
 0x2bc   : > { %v898_v18 = vadd.f32 %v897_v17, %v896_v16 }
 0x2be   : > { %v754_v20 = vadd.f32 %v898_v18, %v825_v9 }
 0x2c0   : > { %v757_v21 = vadd.f32 %v754_v20, %v572_v19 }
 0x2c2   : > { %v826_v22 = vmul.f32 -1.442695, %v757_v21 }
 0x2c4   : > { %1072 = vpow2.f32 %v826_v22 }
 0x2ce   : > { %v1073_v23 = vpop.eup %1072 }
 0x2cf   : > { %v761_v24 = vadd.f32 1.0, %v1073_v23 }
 0x2d1   : > { %1074 = vrcp.f32 %v761_v24 }
 0x2db   : > { %v1075_v6 = vpop.eup %1074 }
 0x2dc   : > { %764 = vst [vmem:[%s273_s11] sm:$0xff] %v1075_v6 }
 0x2dd PF: > { %s17_s24 = sadd.s32 1, %s1082_s24  }
 0x2de   : > { %p14_p4 = scmp.ge.s32.totalorder %s17_s24, 4  }
 0x2e0   :  { %16 = sbr.rel (!%p14_p4) target bundleno = 1 (0x1), region = 78 }

</bundles_post_ra>
